<compile_context>
chip_gen: v7x
topology: tpu7x:2x2x1
jax: 0.10.0
libtpu: 0.0.40
codegen_flags: <defaults>
</compile_context>

<pallas_src>
import math

import jax
import jax.numpy as jnp
import numpy as np
from jax.experimental import pallas as pl
from jax.experimental.pallas import tpu as pltpu


def _round_up(x, m):
    return ((x + m - 1) // m) * m


def _cdiv(a, b):
    return (a + b - 1) // b


def _make_packed_mxu_kernel(add_bias, out_dtype):
    """Lane-dense path.

    t block : (br, k_pad)      rep packed timestamps per row (K zero-padded to >=8)
    s block : (k_pad, lane)    selection matrix with weights folded in:
                               S[j, j*dim + d] = w[d], zeros elsewhere
    out     : (br, lane)       lane = lcm(dim, 128) -> full unmasked 128-lane stores

    The small-K matmul rides the MXU (vector-extended slot), which is otherwise
    completely idle, so the VPU only runs cos (+ optional bias add).
    """

    def kernel(*refs):
        if add_bias:
            t_ref, s_ref, b_ref, o_ref = refs
        else:
            t_ref, s_ref, o_ref = refs
        # precision=HIGHEST (bf16 multi-pass) reproduces the f32 product to ~1 ulp;
        # default single-pass bf16 would be catastrophically inaccurate here.
        y = jnp.dot(t_ref[...], s_ref[...],
                    preferred_element_type=jnp.float32,
                    precision=jax.lax.Precision.HIGHEST)
        if add_bias:
            y = y + b_ref[...]
        o_ref[...] = jnp.cos(y).astype(out_dtype)

    return kernel


def _make_generic_kernel(add_bias, out_dtype):
    """Fallback path: (br, 1) x (1, dim) VPU broadcast multiply.

    Used when rep == 1 (dim is a multiple of 128, already lane-dense) or when
    lcm(dim, 128) is too large to pack sensibly.
    """

    def kernel(*refs):
        if add_bias:
            t_ref, w_ref, b_ref, o_ref = refs
        else:
            t_ref, w_ref, o_ref = refs
        y = t_ref[...] * w_ref[...]
        if add_bias:
            y = y + b_ref[...]
        o_ref[...] = jnp.cos(y).astype(out_dtype)

    return kernel


def time_encode(t, weight, bias=None, *, block_rows=8192,
                out_dtype=jnp.float32,
                vmem_budget_bytes=24 * 1024 * 1024,
                out_buffers=2):
    """TimeEncode forward: cos(t.reshape(-1,1) @ weight.T + bias).

    t:      arbitrary-shaped float array of timestamps.
    weight: (dim, 1) float32 (PyTorch Linear weight).
    bias:   optional (dim,) float32.  TimeEncode's bias is identically zero, so
            None skips the add (and the extra VMEM-resident block).
    out_dtype: float32 matches torch; bf16 halves HBM write traffic on v5e
            (write-roofline-bound) if the consumer tolerates it.
    out_buffers: set to 3 only if a trace shows exposed output writeback DMA
            (v5e); default 2 is the normal double-buffered pipeline.
    Returns (N, dim) array of dtype `out_dtype`.
    """
    dim = int(weight.shape[0])
    t_flat = jnp.asarray(t, jnp.float32).reshape(-1)
    n = int(t_flat.shape[0])
    if n == 0:
        return jnp.zeros((0, dim), out_dtype)

    w_flat = jnp.asarray(weight, jnp.float32).reshape(-1)
    b_flat = None if bias is None else jnp.asarray(bias, jnp.float32).reshape(-1)

    # --- lane-dense packing over lcm(dim, 128) -------------------------------
    g = math.gcd(dim, 128)
    rep = 128 // g                      # timestamps per packed output row
    lane_dim = dim * rep                # lcm(dim, 128): row width, multiple of 128
    use_packed = (rep > 1) and (lane_dim <= 4096)

    if use_packed:
        n_pad = _round_up(n, rep)
        if n_pad != n:
            # Pad < rep timestamps; the out[:n] row-slice below is the only copy
            # and is hit only in this ragged case.
            t_flat = jnp.pad(t_flat, (0, n_pad - n))
        n_rows = n_pad // rep
        k_pad = max(8, rep)             # pad contraction dim to >=8 (exact zeros)
        t_in = t_flat.reshape(n_rows, rep)
        if k_pad != rep:
            t_in = jnp.pad(t_in, ((0, 0), (0, k_pad - rep)))
        lanes = jnp.arange(lane_dim, dtype=jnp.int32)
        rows = jnp.arange(k_pad, dtype=jnp.int32)[:, None]
        s_in = jnp.where((lanes[None, :] // dim) == rows,
                         jnp.take(w_flat, lanes % dim)[None, :],
                         jnp.float32(0.0)).astype(jnp.float32)
        b_in = (None if b_flat is None
                else jnp.take(b_flat, lanes % dim).reshape(1, lane_dim))
        param_arrays = [s_in] + ([] if b_in is None else [b_in])
        kernel = _make_packed_mxu_kernel(b_in is not None, out_dtype)
    else:
        # TODO(synk): dims with lcm(dim,128) > 4096 fall back to broadcast path
        # with masked stores when dim % 128 != 0.
        n_pad = n
        n_rows = n
        lane_dim = dim
        t_in = t_flat.reshape(n_rows, 1)
        w_in = w_flat.reshape(1, dim)
        b_in = None if b_flat is None else b_flat.reshape(1, dim)
        param_arrays = [w_in] + ([] if b_in is None else [b_in])
        kernel = _make_generic_kernel(b_in is not None, out_dtype)

    # --- tile sizing under an explicit, padding-correct VMEM budget ----------
    itemsize_out = jnp.dtype(out_dtype).itemsize
    t_cols = int(t_in.shape[1])
    out_bufs = max(2, int(out_buffers))

    # v7x has 2 TensorCores sharded across the "parallel" grid axis: keep >= ~4
    # grid steps so both get work.  v5e/v6e (1 TC) are unaffected.
    br = min(int(block_rows), _round_up(_cdiv(n_rows, 4), 8), _round_up(n_rows, 8))
    br = max(8, _round_up(br, 8))

    def _footprint(rows):
        # VMEM buffers are (8,128)-tiled: narrow t tiles lane-pad to 128 lanes,
        # rows round up to 8 sublanes.
        rows_p = _round_up(rows, 8)
        f = out_bufs * rows_p * _round_up(lane_dim, 128) * itemsize_out
        f += 2 * rows_p * _round_up(t_cols, 128) * 4          # t double-buffered
        for p in param_arrays:                                 # S / w / bias
            f += 2 * _round_up(int(p.shape[0]), 8) * _round_up(int(p.shape[1]), 128) * 4
        return f

    while _footprint(br) > vmem_budget_bytes and br > 8:
        br = max(8, _round_up(br // 2, 8))

    # Scoped-VMEM request: 1.5x the corrected footprint (floor 16 MiB).  Cap at
    # 64 MiB; raising vmem_budget_bytes beyond ~40 MiB is a v5e/v6e-only play
    # (v7x has 64 MiB physical per TC).
    vmem_limit = int(min(max(_footprint(br) * 3 // 2, 16 * 1024 * 1024),
                         64 * 1024 * 1024))

    grid = (_cdiv(n_rows, br),)         # ragged last block handled by masking

    in_specs = [pl.BlockSpec((br, t_cols), lambda i: (i, 0))]
    in_specs += [pl.BlockSpec(tuple(int(s) for s in p.shape), lambda i: (0, 0))
                 for p in param_arrays]
    args = [t_in] + param_arrays

    if out_bufs != 2:
        out_spec = pl.BlockSpec((br, lane_dim), lambda i: (i, 0),
                                pipeline_mode=pl.Buffered(out_bufs))
    else:
        out_spec = pl.BlockSpec((br, lane_dim), lambda i: (i, 0))

    out = pl.pallas_call(
        kernel,
        out_shape=jax.ShapeDtypeStruct((n_rows, lane_dim), out_dtype),
        grid_spec=pltpu.PrefetchScalarGridSpec(
            num_scalar_prefetch=0,
            grid=grid,
            in_specs=in_specs,
            out_specs=out_spec,
        ),
        compiler_params=pltpu.CompilerParams(
            dimension_semantics=("parallel",),
            vmem_limit_bytes=vmem_limit,
        ),
    )(*args)

    if use_packed:
        out = out.reshape(n_pad, dim)   # row-major view of the packed rows: free
        if n_pad != n:
            out = out[:n]
        return out
    return out.reshape(n, dim)


def make_time_encode_params(dim):
    """Deterministic params matching TimeEncode.__init__."""
    weight = (1.0 / 10.0 ** np.linspace(0, 9, dim, dtype=np.float32)).reshape(dim, 1)
    bias = np.zeros((dim,), dtype=np.float32)
    return jnp.asarray(weight), jnp.asarray(bias)


if __name__ == "__main__":
    key = jax.random.PRNGKey(0)
    k1, k2, k3 = jax.random.split(key, 3)

    # Tolerance note: the packed path computes t*w on the MXU with
    # precision=HIGHEST (bf16 multi-pass), which can differ from the VPU f32
    # product by ~1-2 ulps of the phase (~1.5e-5 at |t*w| ~ 1e2), hence atol=5e-5.
    MXU_RTOL, MXU_ATOL = 1e-5, 5e-5

    # --- case 1: dim=32 -> MXU-packed path (4 timestamps per 128-lane row) ----
    dim = 32
    n_times = 128
    weight, bias = make_time_encode_params(dim)
    t = jax.random.uniform(k1, (n_times,), dtype=jnp.float32) * 100.0

    out = time_encode(t, weight)            # bias is identically zero -> dropped
    out = jax.block_until_ready(out)
    ref = jnp.cos(t.reshape(-1, 1) * weight.reshape(1, -1) + bias[None, :])
    assert out.shape == (n_times, dim) and out.dtype == jnp.float32
    np.testing.assert_allclose(np.asarray(out), np.asarray(ref),
                               rtol=MXU_RTOL, atol=MXU_ATOL)

    # --- case 2: dim=160 -> lcm packing (640-lane rows), ragged n, with bias ---
    dim2 = 160
    w2, b2 = make_time_encode_params(dim2)
    t2 = jax.random.uniform(k2, (50,), dtype=jnp.float32) * 100.0
    out2 = jax.block_until_ready(time_encode(t2, w2, b2))
    ref2 = jnp.cos(t2.reshape(-1, 1) * w2.reshape(1, -1) + b2[None, :])
    assert out2.shape == (50, dim2)
    np.testing.assert_allclose(np.asarray(out2), np.asarray(ref2),
                               rtol=MXU_RTOL, atol=MXU_ATOL)

    # --- case 3: dim=256 (multiple of 128) -> generic VPU broadcast path ------
    dim3 = 256
    w3, b3 = make_time_encode_params(dim3)
    t3 = jax.random.uniform(k3, (40,), dtype=jnp.float32) * 100.0
    out3 = jax.block_until_ready(time_encode(t3, w3))
    ref3 = jnp.cos(t3.reshape(-1, 1) * w3.reshape(1, -1) + b3[None, :])
    assert out3.shape == (40, dim3)
    np.testing.assert_allclose(np.asarray(out3), np.asarray(ref3),
                               rtol=1e-6, atol=1e-6)

    print("KERNEL_OK")
</pallas_src>

<mosaic_0001>
module attributes {stable_mosaic.version = 11 : i64} {
  func.func @kernel(%arg0: i32, %arg1: memref<8x8xf32, #tpu.memory_space<vmem>>, %arg2: memref<8x128xf32, #tpu.memory_space<vmem>>, %arg3: memref<8x128xf32, #tpu.memory_space<vmem>>) attributes {dimension_semantics = [#tpu.dimension_semantics<parallel>], iteration_bounds = array<i64: 4>, scalar_prefetch = 0 : i64, scratch_operands = 0 : i64, tpu.core_type = #tpu.core_type<tc>, window_params = [{transform_indices = @transform_0, window_bounds = array<i64: 8, 8>}, {pipeline_mode = #tpu.pipeline_mode<synchronous>, transform_indices = @transform_1, window_bounds = array<i64: 8, 128>}, {transform_indices = @transform_2, window_bounds = array<i64: 8, 128>}]} {
    %c0 = arith.constant 0 : index
    %c0_0 = arith.constant 0 : index
    %0 = vector.load %arg1[%c0, %c0_0] : memref<8x8xf32, #tpu.memory_space<vmem>>, vector<8x8xf32>
    %c0_1 = arith.constant 0 : index
    %c0_2 = arith.constant 0 : index
    %1 = vector.load %arg2[%c0_1, %c0_2] : memref<8x128xf32, #tpu.memory_space<vmem>>, vector<8x128xf32>
    %cst = arith.constant dense<0.000000e+00> : vector<8x128xf32>
    %2 = tpu.matmul %0, %1, %cst {dimension_numbers = #tpu.dot_dimension_numbers<[1], [0], [0], [1], [0, 0, 1, 1], [], []>, precision = #tpu.contract_precision<fp32>} : vector<8x8xf32>, vector<8x128xf32>, vector<8x128xf32> -> vector<8x128xf32>
    %3 = math.cos %2 : vector<8x128xf32>
    %c0_3 = arith.constant 0 : index
    %c0_4 = arith.constant 0 : index
    %4 = vector.load %arg3[%c0_3, %c0_4] : memref<8x128xf32, #tpu.memory_space<vmem>>, vector<8x128xf32>
    tpu.vector_store %arg3[%c0_3, %c0_4], %3 {strides = array<i32>} : memref<8x128xf32, #tpu.memory_space<vmem>>, vector<8x128xf32>,
    return
  }
  func.func @transform_0(%arg0: i32) -> (i32, i32) {
    %c0_i32 = arith.constant 0 : i32
    %c0_i32_0 = arith.constant 0 : i32
    return %arg0, %c0_i32 : i32, i32
  }
  func.func @transform_1(%arg0: i32) -> (i32, i32) {
    %c0_i32 = arith.constant 0 : i32
    %c0_i32_0 = arith.constant 0 : i32
    %c0_i32_1 = arith.constant 0 : i32
    return %c0_i32, %c0_i32_0 : i32, i32
  }
  func.func @transform_2(%arg0: i32) -> (i32, i32) {
    %c0_i32 = arith.constant 0 : i32
    %c0_i32_0 = arith.constant 0 : i32
    return %arg0, %c0_i32 : i32, i32
  }
}

</mosaic_0001>

<bundles_post_ra>
// kernel: tpu_custom_call.1
= control target key start
LH: loop header
LB: loop body
LE: loop exit
PB: predicated region body
PF: predicated region fallthrough
CT: control target
= control target key end

     0   :  { %7 = vsyncpa [#allocation3], 0  ;;  %s1106_s0 = inlined_call_operand.vmem [shape: f32[32,8], index: 0, kind: input, shape index: {}]   ;;  %s1107_s1 = inlined_call_operand.vmem [shape: f32[8,128], index: 1, kind: input, shape index: {}]   ;;  %s1108_s2 = inlined_call_operand.hbm [shape: f32[32,128], index: 2, kind: output, shape index: {}]  }
   0x1   :  { %9 = vsyncpa [#allocation3 + $0x1], 0  ;;  %s976_s9 = smov 0   ;;  %s978_s10 = smov 0  }
   0x2   :  { %s980_s11 = smov 0   ;;  %s982_s12 = smov 0  }
   0x3 LB: > { %s997_s13 = sadd.s32 4294967295, %s950_s12   ;;  %s768_s14 = sadd.s32 4294967294, %s950_s12   ;;  %s950_s12 = sphi %s982_s12, %s1114_s12   ;;  %s946_s11 = sphi %s980_s11, %s1113_s11   ;;  %s942_s10 = sphi %s978_s10, %s1112_s10   ;;  %s938_s9 = sphi %s976_s9, %s1111_s9  }
   0x4   : > { %s1001_s15 = sadd.s32 1, %s950_s12   ;;  %s69_s16 = sadd.s32 1, %s946_s11 }
   0x5   : > { %s66_s17 = ssub.s32 %s950_s12, %s1001_s15  ;;  %p79_p0 = scmp.ne.s32.totalorder %s946_s11, %s942_s10 }
   0x6   : > { %p67_p1 = scmp.eq.s32.totalorder %s66_s17, 0  ;;  %p80_p2 = scmp.eq.s32.totalorder %s997_s13, 3 }
   0x7   : > { %p85_p3 = scmp.ne.s32.totalorder %s942_s10, %s938_s9  ;;  %p86_p4 = scmp.eq.s32.totalorder %s768_s14, 3 }
   0x8   : > { %s1012_s18 = scalar_select %p67_p1, %s946_s11, %s69_s16  }
   0x9   : > { %p1014_p5 = por %p80_p2, %p79_p0  ;;  %p1018_p6 = por %p86_p4, %p85_p3 }
   0xa   : > { %p771_p7 = scmp.ge.s32.totalorder %s950_s12, 1  ;;  %p114_p8 = scmp.lt.s32.totalorder %s950_s12, 5 }
   0xc   : > { %p115_p9 = pnand %p771_p7, %p114_p8 }
   0xd   : > { %v140_v0 = vld [vmem:[%s1107_s1] sm:$0xff] (!%p115_p9)  ;;  %p135_p10 = scmp.lt.s32.totalorder (!%p115_p9), %s997_s13, 3  ;;  %v952_v1 = vmov (!%p115_p9), 0.0   ;;  %vm953_vm0 = vmmov (!%p115_p9), 0   ;;  %vm141_vm1 = vcmask (!%p115_p9), 64512   ;;  %s132_s28 = sand.u32 (!%p115_p9), 1, %s942_s10  }
   0xe   : > { %118 = sbr.rel (%p115_p9) target bundleno = 360 (0x168), region = 28  ;;  %809 = vmatprep.subr.mxu0 (!%p115_p9), %v952_v1  ;;  %v146_v2 = vand.u32 (!%p115_p9), 4294901760, %v140_v0  ;;  %811 = vmatprep.mubr.msk.f32.mxu0 (!%p115_p9), %vm953_vm0, %v952_v1  ;;  %v954_v29 = vmov (!%p115_p9), 683565275   ;;  %v955_v31 = vmov (!%p115_p9), 2475754826  }
   0xf   : > { %794 = vmatprep.subr.mxu1 (!%p115_p9), %v952_v1  ;;  %796 = vmatprep.mubr.msk.f32.mxu1 (!%p115_p9), %vm953_vm0, %v952_v1  ;;  %v956_v34 = vmov (!%p115_p9), 2131351028   ;;  %v957_v37 = vmov (!%p115_p9), 2102212464   ;;  %v958_v40 = vmov (!%p115_p9), 920167782  }
  0x10   : > { %v223_v3 = vsub.f32 (!%p115_p9), %v140_v0, %v146_v2  ;;  %810 = vmatpush3.msra.mxu0 (!%p115_p9), %v146_v2  ;;  %795 = vmatpush3.msra.mxu1 (!%p115_p9), %v146_v2  ;;  %v959_v43 = vmov (!%p115_p9), 1326507024   ;;  %s772_s29 = sshll.u32 (!%p115_p9), %s132_s28, 3  ;;  %s779_s30 = sshll.u32 (!%p115_p9), %s997_s13, 7 }
  0x11   : > { %799 = vmatprep.subr.mxu1 (!%p115_p9), %v952_v1  ;;  %814 = vmatprep.subr.mxu0 (!%p115_p9), %v952_v1  ;;  %s134_s3 = scalar_lea.vmem (!%p115_p9), [#allocation2], %s772_s29  ;;  %s1064_s7 = scalar_lea.hbm (!%p115_p9), %s1108_s2, %s779_s30 }
  0x12   : > { %v224_v6 = vand.u32 (!%p115_p9), 4294901760, %v223_v3  ;;  %s709_s4 = sshll.u32 (!%p115_p9), %s134_s3, 4  ;;  %s696_s8 = scalar_lea.sflag (!%p115_p9), [#allocation3], %s132_s28  ;;  %s1066_s4 = int_to_ptr.vmem [resolvable:$true] %s709_s4 }
  0x13   : > { %s960_s14 = smov (!%p115_p9), [#allocation2]  }
  0x14   : > { %v225_v9 = vsub.f32 (!%p115_p9), %v223_v3, %v224_v6  ;;  %s892_s16 = sshll.u32 (!%p115_p9), %s960_s14, 4  ;;  %s893_s16 = int_to_ptr.vmem [resolvable:$false] %s892_s16 }
  0x15   : > { %s136_s23 = scalar_select %p135_p10, %s997_s13, 3 }
  0x16   : > { %v226_v12 = vand.u32 4294901760, %v225_v9  ;;  %s888_s13 = scalar_lea.vmem %s1066_s4, 128  ;;  %s894_s17 = scalar_lea.vmem %s893_s16, 256 }
  0x17   : > { %s773_s24 = sshll.u32 %s136_s23, 3  ;;  %p889_p11 = scmp.ne.s32.totalorder %s1066_s4, %s888_s13 }
  0x18   : > { %s138_s27 = scalar_lea.vmem %s1106_s0, %s773_s24  ;;  %p895_p0 = scmp.lt.s32.totalorder %s1066_s4, %s893_s16 }
  0x19   : > { %v139_v4 = vld [vmem:[%s138_s27] sm:$0xff]  ;;  %p890_p12 = pnand %p889_p11, %p1014_p5  ;;  %p896_p1 = scmp.lt.s32.totalorder %s894_s17, %s888_s13 }
  0x1a   : > { %v143_v5 = vsel %vm141_vm1, %v139_v4, 0 }
  0x1b   : > { %v211_v7 = vand.u32 4294901760, %v143_v5  ;;  %p891_p13 = pneg %p890_p12  ;;  %p897_p2 = por %p896_p1, %p895_p0 }
  0x1d   : > { %v212_v8 = vsub.f32 %v143_v5, %v211_v7  ;;  %p898_p3 = pnand %p897_p2, %p891_p13 }
  0x1f   : > { %v213_v10 = vand.u32 4294901760, %v212_v8 }
  0x21   : > { %812 = vmatmul.mubr.f32.vlgmr.msra.gmra.mrb[0].mxu0 %v213_v10  ;;  %v214_v11 = vsub.f32 %v212_v8, %v213_v10 }
  0x22   : > { %815 = vmatpush3.msra.mxu0 %v224_v6  ;;  %816 = vmatprep.mubr.msk.f32.mxu0 %vm953_vm0, %v952_v1 }
  0x23   : > { %v215_v13 = vand.u32 4294901760, %v214_v11  ;;  %819 = vmatprep.subr.mxu0 %v952_v1 }
  0x25   : > { %797 = vmatmul.mubr.f32.vlgmr.msra.gmra.mrb[0].mxu1 %v215_v13 }
  0x26   : > { %800 = vmatpush3.msra.mxu1 %v226_v12  ;;  %801 = vmatprep.mubr.msk.f32.mxu1 %vm953_vm0, %v952_v1 }
  0x27   : > { %804 = vmatprep.subr.mxu1 %v952_v1 }
  0x29   : > { %817 = vmatmul.mubr.f32.vlgmr.msra.gmra.mrb[0].mxu0 %v211_v7 }
  0x2a   : > { %820 = vmatpush3.msra.mxu0 %v146_v2  ;;  %821 = vmatprep.mubr.msk.f32.mxu0 %vm953_vm0, %v952_v1 }
  0x2d   : > { %802 = vmatmul.mubr.f32.vlgmr.msra.gmra.mrb[0].mxu1 %v211_v7 }
  0x2e   : > { %805 = vmatpush3.msra.mxu1 %v223_v3  ;;  %806 = vmatprep.mubr.msk.f32.mxu1 %vm953_vm0, %v952_v1 }
  0x31   : > { %822 = vmatmul.mubr.f32.vlgmr.msra.gmra.mrb[0].mxu0 %v211_v7 }
  0x35   : > { %807 = vmatmul.mubr.f32.vlgmr.msra.gmra.mrb[0].mxu1 %v212_v8 }
 0x104   : > { %v587_v14 = vpop.f32.mrb[0].mxu0 }
 0x105   : > { %v823_v15 = vpop.f32.mrb[1].mxu0 }
 0x108   : > { %v367_v16 = vpop.f32.mrb[0].mxu1 }
 0x109   : > { %v1038_v17 = vadd.f32 %v587_v14, %v367_v16  ;;  %v808_v18 = vpop.f32.mrb[1].mxu1 }
 0x10b   : > { %v594_v19 = vand.u32 2139095040, %v1038_v17  ;;  %v591_v23 = vand.u32 2147483647, %v1038_v17  ;;  %vm593_vm9 = vcmp.lt.s32.totalorder %v1038_v17, 0  ;;  %vm683_vm14 = vweird.f32 %v1038_v17 }
 0x10d   : > { %v595_v20 = vshrl.u32 %v594_v19, 23  ;;  %v598_v26 = vand.u32 8388607, %v591_v23  ;;  %vm592_vm10 = vcmp.le.f32.partialorder %v591_v23, 0.7853982 }
 0x10f   : > { %v774_v21 = vadd.s32 4294967169, %v595_v20  ;;  %v599_v45 = vor.u32 8388608, %v598_v26 }
 0x111   : > { %v601_v22 = vadd.s32 1, %v774_v21  ;;  %v639_v59 = vshll.u32 %v599_v45, 8 }
 0x113   : > { %vm602_vm2 = vcmp.gt.s32.totalorder %v601_v22, 0 }
 0x114   : > { %v603_v24 = vsel %vm602_vm2, %v601_v22, 0 }
 0x115   : > { %v605_v25 = vand.u32 31, %v603_v24  ;;  %v604_v28 = vshrl.u32 %v603_v24, 5 }
 0x117   : > { %v606_v27 = vsub.s32 32, %v605_v25  ;;  %v608_v30 = vshll.u32 %v954_v29, %v605_v25  ;;  %v611_v32 = vshll.u32 %v955_v31, %v605_v25  ;;  %v614_v36 = vshll.u32 %v956_v34, %v605_v25 }
 0x118   : > { %v617_v39 = vshll.u32 %v957_v37, %v605_v25  ;;  %v620_v42 = vshll.u32 %v958_v40, %v605_v25  ;;  %vm623_vm3 = vcmp.lt.s32.totalorder %v604_v28, 1  ;;  %vm626_vm4 = vcmp.lt.s32.totalorder %v604_v28, 4 }
 0x119   : > { %v609_v33 = vshrl.u32 %v955_v31, %v606_v27  ;;  %v612_v35 = vshrl.u32 %v956_v34, %v606_v27  ;;  %v615_v38 = vshrl.u32 %v957_v37, %v606_v27  ;;  %v618_v41 = vshrl.u32 %v958_v40, %v606_v27 }
 0x11a   : > { %v621_v44 = vshrl.u32 %v959_v43, %v606_v27  ;;  %v607_v54 = vshrl.u32 %v954_v29, %v606_v27  ;;  %vm625_vm5 = vcmp.lt.s32.totalorder %v604_v28, 3  ;;  %vm624_vm6 = vcmp.lt.s32.totalorder %v604_v28, 2 }
 0x11b   : > { %v610_v46 = vor.u32 %v609_v33, %v608_v30  ;;  %v613_v47 = vor.u32 %v612_v35, %v611_v32  ;;  %v616_v48 = vor.u32 %v615_v38, %v614_v36  ;;  %v619_v49 = vor.u32 %v618_v41, %v617_v39 }
 0x11c   : > { %v622_v50 = vor.u32 %v621_v44, %v620_v42 }
 0x11d   : > { %v628_v51 = vsel %vm626_vm4, %v616_v48, 2102212464  ;;  %v631_v52 = vsel %vm623_vm3, %v610_v46, %v613_v47  ;;  %v635_v53 = vsel %vm623_vm3, %v613_v47, %v616_v48  ;;  %v632_v55 = vsel %vm626_vm4, %v619_v49, 920167782 }
 0x11e   : > { %v636_v56 = vsel %vm626_vm4, %v622_v50, 1326507024  ;;  %v633_v57 = vsel %vm625_vm5, %v616_v48, %v632_v55  ;;  %v627_v60 = vsel %vm623_vm3, %v607_v54, %v610_v46  ;;  %v629_v61 = vsel %vm625_vm5, %v613_v47, %v628_v51 }
 0x11f   : > { %v637_v58 = vsel %vm625_vm5, %v619_v49, %v636_v56  ;;  %v634_v62 = vsel %vm624_vm6, %v631_v52, %v633_v57  ;;  %v630_v4 = vsel %vm624_vm6, %v627_v60, %v629_v61 }
 0x120   : > { %v638_v63 = vsel %vm624_vm6, %v635_v53, %v637_v58  ;;  %v1047_v2 = vmul.u32.u64.low %v639_v59, %v634_v62  ;;  %v1048_v3 = vmul.u32.u64.high %v639_v59, %v634_v62, %v1047_v2  ;;  %v646_v6 = vmul.u32 %v639_v59, %v630_v4 }
 0x121   : > { %v1044_v0 = vmul.u32.u64.low %v639_v59, %v638_v63  ;;  %v1045_v1 = vmul.u32.u64.high %v639_v59, %v638_v63, %v1044_v0 }
 0x122   : > { %v649_v5 = vadd.s32 1, %v1048_v3 }
 0x123   : > { %vm648_vm7 = vc.u32 %v1045_v1, %v1047_v2  ;;  %v647_v19 = vadd.s32 %v1047_v2, %v1045_v1 }
 0x124   : > { %v650_v7 = vsel %vm648_vm7, %v649_v5, %v1048_v3 }
 0x125   : > { %v651_v8 = vadd.s32 %v650_v7, %v646_v6 }
 0x127   : > { %v652_v9 = vadd.s32 536870912, %v651_v8 }
 0x129   : > { %v653_v10 = vshrl.u32 %v652_v9, 30 }
 0x12b   : > { %v654_v11 = vshll.u32 %v653_v10, 30  ;;  %v677_v34 = vsub.s32 4, %v653_v10 }
 0x12d   : > { %v655_v12 = vsub.s32 %v651_v8, %v654_v11  ;;  %v678_v36 = vsel %vm593_vm9, %v677_v34, %v653_v10 }
 0x12e   : > { %v680_v37 = vsel %vm592_vm10, 0, %v678_v36 }
 0x12f   : > { %v657_v13 = vsub.s32 0, %v655_v12  ;;  %v684_v38 = vand.u32 3, %v680_v37 }
 0x131   : > { %v775_v14 = vmin.u32 %v657_v13, %v655_v12  ;;  %vm689_vm11 = vcmp.eq.s32.totalorder %v684_v38, 2  ;;  %vm686_vm12 = vcmp.eq.s32.totalorder %v684_v38, 0  ;;  %vm685_vm13 = vcmp.lt.s32.totalorder %v684_v38, 2 }
 0x133   : > { %v659_v15 = vclz %v775_v14 }
 0x135   : > { %v776_v16 = vadd.s32 4294967294, %v659_v15 }
 0x137   : > { %vm777_vm8 = vcmp.lt.s32.totalorder %v776_v16, 0 }
 0x138   : > { %v662_v18 = vsel %vm777_vm8, 0, %v776_v16 }
 0x139   : > { %v663_v20 = vsub.s32 32, %v662_v18  ;;  %v667_v21 = vsub.s32 4294967266, %v662_v18  ;;  %v664_v22 = vshll.u32 %v655_v12, %v662_v18 }
 0x13b   : > { %v665_v24 = vshrl.u32 %v647_v19, %v663_v20  ;;  %v668_v25 = vadd.s32 127, %v667_v21 }
 0x13d   : > { %v666_v26 = vor.u32 %v665_v24, %v664_v22  ;;  %v669_v27 = vshll.u32 %v668_v25, 23 }
 0x13f   : > { %v670_v28 = vor.u32 4788187, %v669_v27  ;;  %v673_v30 = vcvt.s32.f32 %v666_v26 }
 0x141   : > { %v671_v29 = vand.u32 2147483647, %v670_v28 }
 0x143   : > { %v674_v31 = vmul.f32 %v673_v30, %v671_v29 }
 0x145   : > { %v675_v32 = vxor.u32 2147483648, %v674_v31 }
 0x147   : > { %v676_v33 = vsel %vm593_vm9, %v675_v32, %v674_v31 }
 0x148   : > { %v679_v35 = vsel %vm592_vm10, %v1038_v17, %v676_v33 }
 0x149   : > { %884 = vcosq.f32 %v679_v35 }
 0x14a   : > { %886 = vsinq.f32 %v679_v35 }
 0x153   : > { %v885_v39 = vpop.eup %884 }
 0x154   : > { %v887_v40 = vpop.eup %886  ;;  %v690_v41 = vxor.u32 2147483648, %v885_v39 }
 0x155   : > { %v687_v42 = vxor.u32 2147483648, %v887_v40 }
 0x156   : > { %v691_v23 = vsel %vm689_vm11, %v690_v41, %v887_v40 }
 0x157   : > { %v688_v43 = vsel %vm686_vm12, %v885_v39, %v687_v42 }
 0x158   : > { %v692_v44 = vsel %vm685_vm13, %v688_v43, %v691_v23 }
 0x159   : > { %v693_v45 = vsel %vm683_vm14, nan, %v692_v44 }
 0x15a   : > { %694 = vst [vmem:[%s134_s3] sm:$0xff] %v693_v45 }
 0x15b   : > { %901 = shalt.err (!%p898_p3)
}
 0x15c   : > { %s902_s21 = scalar_lea.hbm %s1064_s7, 128  ;;  %s906_s24 = scalar_lea.hbm %s1108_s2, 512 }
 0x15d   : > { %p903_p4 = scmp.ne.s32.totalorder %s1064_s7, %s902_s21  ;;  %p907_p9 = scmp.lt.u32.totalorder %s1064_s7, %s1108_s2 }
 0x15e   : > { %p908_p10 = scmp.lt.u32.totalorder %s906_s24, %s902_s21  ;;  %p910_p12 = scmp.lt.u32.totalorder %s902_s21, %s1064_s7 }
 0x15f   : > { %p904_p7 = pnand %p903_p4, %p1014_p5 }
 0x160   : > { %p909_p11 = por %p908_p10, %p907_p9 }
 0x161   : > { %p905_p8 = pneg %p904_p7 }
 0x162   : > { %p911_p13 = por %p910_p12, %p909_p11 }
 0x164   : > { %p912_p0 = pnand %p911_p13, %p905_p8 }
 0x166   : > { %915 = shalt.err (!%p912_p0)
}
 0x167   : > { %837 = dma.vmem_to_hbm [thread:$0]  (%p1014_p5), %s1066_s4, 128, %s1064_s7, %s696_s8  }
 0x168 PF: > { %p843_p1 = scmp.ge.s32.totalorder %s950_s12, 2  ;;  %s721_s27 = sand.u32 1, %s938_s9  }
 0x169   : > { %s722_s28 = scalar_lea.sflag [#allocation3], %s721_s27 }
 0x16a   : > { %p840_p2 = pnand %p843_p1, %p1018_p6 }
 0x16c   : > { %933 = dma.done.wait (!%p840_p2), %s722_s28, 128  }
 0x16d   : > { %935 = vsyncadd (!%p840_p2), %s722_s28, 4294967168  ;;  %p12_p3 = scmp.ge.s32.totalorder %s1001_s15, 6   ;;  %s1111_s9 = smov %s942_s10 }
 0x16e   : > { %s1112_s10 = smov %s946_s11  ;;  %s1113_s11 = smov %s1012_s18 }
 0x16f   : > { %s1114_s12 = smov %s1001_s15  ;;  %14 = sbr.rel (!%p12_p3) target bundleno = 3 (0x3), region = 63 }
 0x176   :  { %727 = vsyncpa [#allocation3], 1 }
 0x177   :  { %729 = vsyncpa [#allocation3 + $0x1], 1 }

</bundles_post_ra>
